<compile_context>
chip_gen: v6e
topology: v6e:2x2x1
jax: 0.10.0
libtpu: 0.0.40
codegen_flags: <defaults>
</compile_context>

<pallas_src>
import functools

import jax
import jax.numpy as jnp
from jax import lax
from jax.experimental import pallas as pl
from jax.experimental.pallas import tpu as pltpu


# --------------------------------- the kernel --------------------------------

def _ff_kernel(x_ref, lg_ref, lb_ref, w1_ref, b1_ref, w2_ref, b2_ref, o_ref,
               *, eps):
    # x block: (TM, D).  LayerNorm / bias / swish math stays in f32.
    x = x_ref[...].astype(jnp.float32)
    d = x.shape[-1]

    # ---- LayerNorm, two-pass statistics (numerically robust) ----
    mu = jnp.sum(x, axis=-1, keepdims=True) * (1.0 / d)
    xc = x - mu
    var = jnp.sum(xc * xc, axis=-1, keepdims=True) * (1.0 / d)
    h = xc * lax.rsqrt(var + eps)
    h = h * lg_ref[...] + lb_ref[...]

    # ---- Linear1: bf16 MXU operands, f32 accumulation ----
    h1 = jnp.dot(h.astype(jnp.bfloat16), w1_ref[...],
                 preferred_element_type=jnp.float32) + b1_ref[...]

    # ---- Swish: exp (EUP) + approx reciprocal (EUP slot, ~free) ----
    sig = pl.reciprocal(1.0 + jnp.exp(-h1), approx=True)
    h1 = (h1 * sig).astype(jnp.bfloat16)

    # Dropout = identity in eval mode.

    # ---- Linear2: bf16 MXU operands, f32 accumulation ----
    y = jnp.dot(h1, w2_ref[...],
                preferred_element_type=jnp.float32) + b2_ref[...]

    o_ref[...] = y.astype(o_ref.dtype)


# ---------------------------------- wrapper -----------------------------------

def prepare_params(params):
    """One-time prep: bf16 matmul weights, f32 (1, D)/(1, Dff) row vectors."""
    D = params["ln_g"].shape[0]
    Dff = params["w1"].shape[1]
    return {
        "ln_g": params["ln_g"].reshape(1, D).astype(jnp.float32),
        "ln_b": params["ln_b"].reshape(1, D).astype(jnp.float32),
        "w1": params["w1"].astype(jnp.bfloat16),    # (D, Dff), x @ W layout
        "b1": params["b1"].reshape(1, Dff).astype(jnp.float32),
        "w2": params["w2"].astype(jnp.bfloat16),    # (Dff, D)
        "b2": params["b2"].reshape(1, D).astype(jnp.float32),
    }


def conformer_feed_forward(x, prepped, *, block_rows=512, eps=1e-5,
                           vmem_limit_bytes=56 * 1024 * 1024):
    """x: (B, S, D) float32.  prepped: output of prepare_params().

    block_rows is the per-generation tuning knob:
      v5e/v6e: 512-1024 comfortably fits once vmem_limit_bytes is raised.
      v7x: keep <= 512 (64 MiB per-TC VMEM); at small B*S pick block_rows so
           the grid length is >= 2 (ideally even) to feed both TensorCores.
    """
    B, S, D = x.shape
    Dff = prepped["w1"].shape[1]
    N = B * S
    xf = x.reshape(N, D)

    # Row tile: full extent if small, else a multiple of 8. The grid uses
    # cdiv, so a ragged last block is masked by Pallas (no host-side padding).
    tm = min(block_rows, N)
    if tm < N:
        tm = max(8, (tm // 8) * 8)
    grid = (pl.cdiv(N, tm),)

    lg, lb = prepped["ln_g"], prepped["ln_b"]
    w1, b1 = prepped["w1"], prepped["b1"]
    w2, b2 = prepped["w2"], prepped["b2"]
    consts = [lg, lb, w1, b1, w2, b2]

    cost = pl.CostEstimate(
        flops=4 * N * D * Dff + 10 * N * Dff + 10 * N * D,   # 2 matmuls + LN/swish
        transcendentals=N * Dff,                              # sigmoid exp
        bytes_accessed=(2 * N * D) * 4                        # x in + y out (f32)
        + (w1.size + w2.size) * 2                             # bf16 weights
        + (lg.size + lb.size + b1.size + b2.size) * 4,
    )

    def make_call(use_single_buffer):
        def const_spec(p, single=False):
            nd = p.ndim
            zero_map = lambda i, nd=nd: (0,) * nd
            if single and use_single_buffer:
                # Constant across the grid: single-buffer to halve weight VMEM.
                return pl.BlockSpec(p.shape, zero_map,
                                    pipeline_mode=pl.Buffered(1))
            return pl.BlockSpec(p.shape, zero_map)

        in_specs = [pl.BlockSpec((tm, D), lambda i: (i, 0)),
                    const_spec(lg), const_spec(lb),
                    const_spec(w1, single=True), const_spec(b1),
                    const_spec(w2, single=True), const_spec(b2)]

        return pl.pallas_call(
            functools.partial(_ff_kernel, eps=eps),
            out_shape=jax.ShapeDtypeStruct((N, D), x.dtype),
            grid=grid,
            in_specs=in_specs,
            out_specs=pl.BlockSpec((tm, D), lambda i: (i, 0)),
            compiler_params=pltpu.CompilerParams(
                dimension_semantics=("parallel",),
                vmem_limit_bytes=vmem_limit_bytes),
            cost_estimate=cost,
        )

    try:
        out = make_call(True)(xf, *consts)
    except Exception:
        # Fallback for jax builds that reject pipeline_mode on pallas_call
        # BlockSpecs: identical math, default (double) buffering.
        out = make_call(False)(xf, *consts)

    return out.reshape(B, S, D)


# ------------------------- deterministic parameter init -----------------------

def init_params(key, D, ff_ratio):
    Dff = ff_ratio * D
    k1, k2, k3, k4 = jax.random.split(key, 4)

    def w(k, shape, scale=0.05):
        return jax.random.normal(k, shape, jnp.float32) * scale

    return {
        "ln_g": jnp.ones((D,), jnp.float32),
        "ln_b": jnp.zeros((D,), jnp.float32),
        "w1": w(k1, (D, Dff)),     # stored (in, out): kernel does x @ W
        "b1": w(k2, (Dff,)),
        "w2": w(k3, (Dff, D)),
        "b2": w(k4, (D,)),
    }


# ----------------------------- pure-JAX reference -----------------------------

def reference(x, p, eps=1e-5):
    mu = x.mean(-1, keepdims=True)
    var = ((x - mu) ** 2).mean(-1, keepdims=True)
    h = (x - mu) / jnp.sqrt(var + eps) * p["ln_g"] + p["ln_b"]
    h = h @ p["w1"] + p["b1"]
    h = h * (1.0 / (1.0 + jnp.exp(-h)))          # swish (dropout = identity)
    return h @ p["w2"] + p["b2"]


# ------------------------------------ main ------------------------------------

if __name__ == "__main__":
    B, S, D = 2, 8, 32
    FF_RATIO = 4

    key = jax.random.PRNGKey(0)
    kx, kp, kx2 = jax.random.split(key, 3)
    x = jax.random.normal(kx, (B, S, D), jnp.float32)
    params = init_params(kp, D, FF_RATIO)
    prepped = prepare_params(params)

    ref = jax.block_until_ready(reference(x, params))

    # single-tile path (block covers all rows)
    out = jax.block_until_ready(conformer_feed_forward(x, prepped))
    assert out.shape == (B, S, D), out.shape
    err = float(jnp.max(jnp.abs(out - ref)))
    assert err < 2e-2, f"mismatch vs reference (single tile): {err}"

    # multi-tile path (row axis tiled across the grid, divides evenly)
    out_t = jax.block_until_ready(
        conformer_feed_forward(x, prepped, block_rows=8))
    err_t = float(jnp.max(jnp.abs(out_t - ref)))
    assert err_t < 2e-2, f"mismatch vs reference (tiled): {err_t}"

    # ragged path (N = 3*5 = 15 rows, 8-row tile -> partial last block, no padding)
    x2 = jax.random.normal(kx2, (3, 5, D), jnp.float32)
    ref2 = jax.block_until_ready(reference(x2, params))
    out_r = jax.block_until_ready(
        conformer_feed_forward(x2, prepped, block_rows=8))
    err_r = float(jnp.max(jnp.abs(out_r - ref2)))
    assert err_r < 2e-2, f"mismatch vs reference (ragged): {err_r}"

    print("KERNEL_OK")
</pallas_src>

<mosaic_0001>
module attributes {stable_mosaic.version = 11 : i64} {
  func.func @_ff_kernel(%arg0: i32, %arg1: memref<16x32xf32, #tpu.memory_space<vmem>>, %arg2: memref<1x32xf32, #tpu.memory_space<vmem>>, %arg3: memref<1x32xf32, #tpu.memory_space<vmem>>, %arg4: memref<32x128xbf16, #tpu.memory_space<vmem>>, %arg5: memref<1x128xf32, #tpu.memory_space<vmem>>, %arg6: memref<128x32xbf16, #tpu.memory_space<vmem>>, %arg7: memref<1x32xf32, #tpu.memory_space<vmem>>, %arg8: memref<16x32xf32, #tpu.memory_space<vmem>>) attributes {dimension_semantics = [#tpu.dimension_semantics<parallel>], iteration_bounds = array<i64: 1>, scalar_prefetch = 0 : i64, scratch_operands = 0 : i64, tpu.core_type = #tpu.core_type<tc>, window_params = [{transform_indices = @transform_0, window_bounds = array<i64: 16, 32>}, {pipeline_mode = #tpu.pipeline_mode<synchronous>, transform_indices = @transform_1, window_bounds = array<i64: 1, 32>}, {pipeline_mode = #tpu.pipeline_mode<synchronous>, transform_indices = @transform_2, window_bounds = array<i64: 1, 32>}, {pipeline_mode = #tpu.pipeline_mode<synchronous>, transform_indices = @transform_3, window_bounds = array<i64: 32, 128>}, {pipeline_mode = #tpu.pipeline_mode<synchronous>, transform_indices = @transform_4, window_bounds = array<i64: 1, 128>}, {pipeline_mode = #tpu.pipeline_mode<synchronous>, transform_indices = @transform_5, window_bounds = array<i64: 128, 32>}, {pipeline_mode = #tpu.pipeline_mode<synchronous>, transform_indices = @transform_6, window_bounds = array<i64: 1, 32>}, {transform_indices = @transform_7, window_bounds = array<i64: 16, 32>}]} {
    %c0 = arith.constant 0 : index
    %c0_0 = arith.constant 0 : index
    %0 = vector.load %arg1[%c0, %c0_0] : memref<16x32xf32, #tpu.memory_space<vmem>>, vector<16x32xf32>
    %cst = arith.constant dense<0.000000e+00> : vector<16xf32>
    %1 = vector.multi_reduction <add>, %0, %cst [1] : vector<16x32xf32> to vector<16xf32>
    %2 = vector.shape_cast %1 : vector<16xf32> to vector<16x1xf32>
    %cst_1 = arith.constant 3.125000e-02 : f32
    %3 = vector.broadcast %cst_1 : f32 to vector<16x1xf32>
    %4 = arith.mulf %2, %3 : vector<16x1xf32>
    %5 = vector.broadcast %4 : vector<16x1xf32> to vector<16x32xf32>
    %6 = arith.subf %0, %5 : vector<16x32xf32>
    %7 = arith.mulf %6, %6 : vector<16x32xf32>
    %cst_2 = arith.constant dense<0.000000e+00> : vector<16xf32>
    %8 = vector.multi_reduction <add>, %7, %cst_2 [1] : vector<16x32xf32> to vector<16xf32>
    %9 = vector.shape_cast %8 : vector<16xf32> to vector<16x1xf32>
    %cst_3 = arith.constant 3.125000e-02 : f32
    %10 = vector.broadcast %cst_3 : f32 to vector<16x1xf32>
    %11 = arith.mulf %9, %10 : vector<16x1xf32>
    %cst_4 = arith.constant 9.99999974E-6 : f32
    %12 = vector.broadcast %cst_4 : f32 to vector<16x1xf32>
    %13 = arith.addf %11, %12 : vector<16x1xf32>
    %14 = math.rsqrt %13 : vector<16x1xf32>
    %15 = vector.broadcast %14 : vector<16x1xf32> to vector<16x32xf32>
    %16 = arith.mulf %6, %15 : vector<16x32xf32>
    %c0_5 = arith.constant 0 : index
    %c0_6 = arith.constant 0 : index
    %17 = vector.load %arg2[%c0_5, %c0_6] : memref<1x32xf32, #tpu.memory_space<vmem>>, vector<1x32xf32>
    %18 = vector.broadcast %17 : vector<1x32xf32> to vector<16x32xf32>
    %19 = arith.mulf %16, %18 : vector<16x32xf32>
    %c0_7 = arith.constant 0 : index
    %c0_8 = arith.constant 0 : index
    %20 = vector.load %arg3[%c0_7, %c0_8] : memref<1x32xf32, #tpu.memory_space<vmem>>, vector<1x32xf32>
    %21 = vector.broadcast %20 : vector<1x32xf32> to vector<16x32xf32>
    %22 = arith.addf %19, %21 : vector<16x32xf32>
    %23 = arith.truncf %22 : vector<16x32xf32> to vector<16x32xbf16>
    %c0_9 = arith.constant 0 : index
    %c0_10 = arith.constant 0 : index
    %24 = vector.load %arg4[%c0_9, %c0_10] : memref<32x128xbf16, #tpu.memory_space<vmem>>, vector<32x128xbf16>
    %cst_11 = arith.constant dense<0.000000e+00> : vector<16x128xf32>
    %25 = tpu.matmul %23, %24, %cst_11 {dimension_numbers = #tpu.dot_dimension_numbers<[1], [0], [0], [1], [0, 0, 1, 1], [], []>} : vector<16x32xbf16>, vector<32x128xbf16>, vector<16x128xf32> -> vector<16x128xf32>
    %c0_12 = arith.constant 0 : index
    %c0_13 = arith.constant 0 : index
    %26 = vector.load %arg5[%c0_12, %c0_13] : memref<1x128xf32, #tpu.memory_space<vmem>>, vector<1x128xf32>
    %27 = vector.broadcast %26 : vector<1x128xf32> to vector<16x128xf32>
    %28 = arith.addf %25, %27 : vector<16x128xf32>
    %cst_14 = arith.constant 0.000000e+00 : f32
    %29 = vector.broadcast %cst_14 : f32 to vector<16x128xf32>
    %30 = arith.subf %29, %28 : vector<16x128xf32>
    %31 = math.exp %30 : vector<16x128xf32>
    %cst_15 = arith.constant 1.000000e+00 : f32
    %32 = vector.broadcast %cst_15 : f32 to vector<16x128xf32>
    %33 = arith.addf %32, %31 : vector<16x128xf32>
    %34 = tpu.reciprocal %33 {approx = true} : vector<16x128xf32> -> vector<16x128xf32>
    %35 = arith.mulf %28, %34 : vector<16x128xf32>
    %36 = arith.truncf %35 : vector<16x128xf32> to vector<16x128xbf16>
    %c0_16 = arith.constant 0 : index
    %c0_17 = arith.constant 0 : index
    %37 = vector.load %arg6[%c0_16, %c0_17] : memref<128x32xbf16, #tpu.memory_space<vmem>>, vector<128x32xbf16>
    %cst_18 = arith.constant dense<0.000000e+00> : vector<16x32xf32>
    %38 = tpu.matmul %36, %37, %cst_18 {dimension_numbers = #tpu.dot_dimension_numbers<[1], [0], [0], [1], [0, 0, 1, 1], [], []>} : vector<16x128xbf16>, vector<128x32xbf16>, vector<16x32xf32> -> vector<16x32xf32>
    %c0_19 = arith.constant 0 : index
    %c0_20 = arith.constant 0 : index
    %39 = vector.load %arg7[%c0_19, %c0_20] : memref<1x32xf32, #tpu.memory_space<vmem>>, vector<1x32xf32>
    %40 = vector.broadcast %39 : vector<1x32xf32> to vector<16x32xf32>
    %41 = arith.addf %38, %40 : vector<16x32xf32>
    %c0_21 = arith.constant 0 : index
    %c0_22 = arith.constant 0 : index
    %42 = vector.load %arg8[%c0_21, %c0_22] : memref<16x32xf32, #tpu.memory_space<vmem>>, vector<16x32xf32>
    tpu.vector_store %arg8[%c0_21, %c0_22], %41 {strides = array<i32>} : memref<16x32xf32, #tpu.memory_space<vmem>>, vector<16x32xf32>,
    return
  }
  func.func @transform_0(%arg0: i32) -> (i32, i32) {
    %c0_i32 = arith.constant 0 : i32
    %c0_i32_0 = arith.constant 0 : i32
    return %arg0, %c0_i32 : i32, i32
  }
  func.func @transform_1(%arg0: i32) -> (i32, i32) {
    %c0_i32 = arith.constant 0 : i32
    %c0_i32_0 = arith.constant 0 : i32
    %c0_i32_1 = arith.constant 0 : i32
    return %c0_i32, %c0_i32_0 : i32, i32
  }
  func.func @transform_2(%arg0: i32) -> (i32, i32) {
    %c0_i32 = arith.constant 0 : i32
    %c0_i32_0 = arith.constant 0 : i32
    %c0_i32_1 = arith.constant 0 : i32
    return %c0_i32, %c0_i32_0 : i32, i32
  }
  func.func @transform_3(%arg0: i32) -> (i32, i32) {
    %c0_i32 = arith.constant 0 : i32
    %c0_i32_0 = arith.constant 0 : i32
    %c0_i32_1 = arith.constant 0 : i32
    return %c0_i32, %c0_i32_0 : i32, i32
  }
  func.func @transform_4(%arg0: i32) -> (i32, i32) {
    %c0_i32 = arith.constant 0 : i32
    %c0_i32_0 = arith.constant 0 : i32
    %c0_i32_1 = arith.constant 0 : i32
    return %c0_i32, %c0_i32_0 : i32, i32
  }
  func.func @transform_5(%arg0: i32) -> (i32, i32) {
    %c0_i32 = arith.constant 0 : i32
    %c0_i32_0 = arith.constant 0 : i32
    %c0_i32_1 = arith.constant 0 : i32
    return %c0_i32, %c0_i32_0 : i32, i32
  }
  func.func @transform_6(%arg0: i32) -> (i32, i32) {
    %c0_i32 = arith.constant 0 : i32
    %c0_i32_0 = arith.constant 0 : i32
    %c0_i32_1 = arith.constant 0 : i32
    return %c0_i32, %c0_i32_0 : i32, i32
  }
  func.func @transform_7(%arg0: i32) -> (i32, i32) {
    %c0_i32 = arith.constant 0 : i32
    %c0_i32_0 = arith.constant 0 : i32
    return %arg0, %c0_i32 : i32, i32
  }
}

module attributes {stable_mosaic.version = 11 : i64} {
  func.func @_ff_kernel(%arg0: i32, %arg1: memref<16x32xf32, #tpu.memory_space<vmem>>, %arg2: memref<1x32xf32, #tpu.memory_space<vmem>>, %arg3: memref<1x32xf32, #tpu.memory_space<vmem>>, %arg4: memref<32x128xbf16, #tpu.memory_space<vmem>>, %arg5: memref<1x128xf32, #tpu.memory_space<vmem>>, %arg6: memref<128x32xbf16, #tpu.memory_space<vmem>>, %arg7: memref<1x32xf32, #tpu.memory_space<vmem>>, %arg8: memref<16x32xf32, #tpu.memory_space<vmem>>) attributes {dimension_semantics = [#tpu.dimension_semantics<parallel>], iteration_bounds = array<i64: 1>, scalar_prefetch = 0 : i64, scratch_operands = 0 : i64, tpu.core_type = #tpu.core_type<tc>, window_params = [{transform_indices = @transform_0, window_bounds = array<i64: 16, 32>}, {pipeline_mode = #tpu.pipeline_mode<synchronous>, transform_indices = @transform_1, window_bounds = array<i64: 1, 32>}, {pipeline_mode = #tpu.pipeline_mode<synchronous>, transform_indices = @transform_2, window_bounds = array<i64: 1, 32>}, {pipeline_mode = #tpu.pipeline_mode<synchronous>, transform_indices = @transform_3, window_bounds = array<i64: 32, 128>}, {pipeline_mode = #tpu.pipeline_mode<synchronous>, transform_indices = @transform_4, window_bounds = array<i64: 1, 128>}, {pipeline_mode = #tpu.pipeline_mode<synchronous>, transform_indices = @transform_5, window_bounds = array<i64: 128, 32>}, {pipeline_mode = #tpu.pipeline_mode<synchronous>, transform_indices = @transform_6, window_bounds = array<i64: 1, 32>}, {transform_indices = @transform_7, window_bounds = array<i64: 16, 32>}]} {
    %c0 = arith.constant 0 : index
    %c0_0 = arith.constant 0 : index
    %0 = vector.load %arg1[%c0, %c0_0] : memref<16x32xf32, #tpu.memory_space<vmem>>, vector<16x32xf32>
    %cst = arith.constant dense<0.000000e+00> : vector<16xf32>
    %1 = vector.multi_reduction <add>, %0, %cst [1] : vector<16x32xf32> to vector<16xf32>
    %2 = vector.shape_cast %1 : vector<16xf32> to vector<16x1xf32>
    %cst_1 = arith.constant 3.125000e-02 : f32
    %3 = vector.broadcast %cst_1 : f32 to vector<16x1xf32>
    %4 = arith.mulf %2, %3 : vector<16x1xf32>
    %5 = vector.broadcast %4 : vector<16x1xf32> to vector<16x32xf32>
    %6 = arith.subf %0, %5 : vector<16x32xf32>
    %7 = arith.mulf %6, %6 : vector<16x32xf32>
    %cst_2 = arith.constant dense<0.000000e+00> : vector<16xf32>
    %8 = vector.multi_reduction <add>, %7, %cst_2 [1] : vector<16x32xf32> to vector<16xf32>
    %9 = vector.shape_cast %8 : vector<16xf32> to vector<16x1xf32>
    %cst_3 = arith.constant 3.125000e-02 : f32
    %10 = vector.broadcast %cst_3 : f32 to vector<16x1xf32>
    %11 = arith.mulf %9, %10 : vector<16x1xf32>
    %cst_4 = arith.constant 9.99999974E-6 : f32
    %12 = vector.broadcast %cst_4 : f32 to vector<16x1xf32>
    %13 = arith.addf %11, %12 : vector<16x1xf32>
    %14 = math.rsqrt %13 : vector<16x1xf32>
    %15 = vector.broadcast %14 : vector<16x1xf32> to vector<16x32xf32>
    %16 = arith.mulf %6, %15 : vector<16x32xf32>
    %c0_5 = arith.constant 0 : index
    %c0_6 = arith.constant 0 : index
    %17 = vector.load %arg2[%c0_5, %c0_6] : memref<1x32xf32, #tpu.memory_space<vmem>>, vector<1x32xf32>
    %18 = vector.broadcast %17 : vector<1x32xf32> to vector<16x32xf32>
    %19 = arith.mulf %16, %18 : vector<16x32xf32>
    %c0_7 = arith.constant 0 : index
    %c0_8 = arith.constant 0 : index
    %20 = vector.load %arg3[%c0_7, %c0_8] : memref<1x32xf32, #tpu.memory_space<vmem>>, vector<1x32xf32>
    %21 = vector.broadcast %20 : vector<1x32xf32> to vector<16x32xf32>
    %22 = arith.addf %19, %21 : vector<16x32xf32>
    %23 = arith.truncf %22 : vector<16x32xf32> to vector<16x32xbf16>
    %c0_9 = arith.constant 0 : index
    %c0_10 = arith.constant 0 : index
    %24 = vector.load %arg4[%c0_9, %c0_10] : memref<32x128xbf16, #tpu.memory_space<vmem>>, vector<32x128xbf16>
    %cst_11 = arith.constant dense<0.000000e+00> : vector<16x128xf32>
    %25 = tpu.matmul %23, %24, %cst_11 {dimension_numbers = #tpu.dot_dimension_numbers<[1], [0], [0], [1], [0, 0, 1, 1], [], []>} : vector<16x32xbf16>, vector<32x128xbf16>, vector<16x128xf32> -> vector<16x128xf32>
    %c0_12 = arith.constant 0 : index
    %c0_13 = arith.constant 0 : index
    %26 = vector.load %arg5[%c0_12, %c0_13] : memref<1x128xf32, #tpu.memory_space<vmem>>, vector<1x128xf32>
    %27 = vector.broadcast %26 : vector<1x128xf32> to vector<16x128xf32>
    %28 = arith.addf %25, %27 : vector<16x128xf32>
    %cst_14 = arith.constant 0.000000e+00 : f32
    %29 = vector.broadcast %cst_14 : f32 to vector<16x128xf32>
    %30 = arith.subf %29, %28 : vector<16x128xf32>
    %31 = math.exp %30 : vector<16x128xf32>
    %cst_15 = arith.constant 1.000000e+00 : f32
    %32 = vector.broadcast %cst_15 : f32 to vector<16x128xf32>
    %33 = arith.addf %32, %31 : vector<16x128xf32>
    %34 = tpu.reciprocal %33 {approx = true} : vector<16x128xf32> -> vector<16x128xf32>
    %35 = arith.mulf %28, %34 : vector<16x128xf32>
    %36 = arith.truncf %35 : vector<16x128xf32> to vector<16x128xbf16>
    %c0_16 = arith.constant 0 : index
    %c0_17 = arith.constant 0 : index
    %37 = vector.load %arg6[%c0_16, %c0_17] : memref<128x32xbf16, #tpu.memory_space<vmem>>, vector<128x32xbf16>
    %cst_18 = arith.constant dense<0.000000e+00> : vector<16x32xf32>
    %38 = tpu.matmul %36, %37, %cst_18 {dimension_numbers = #tpu.dot_dimension_numbers<[1], [0], [0], [1], [0, 0, 1, 1], [], []>} : vector<16x128xbf16>, vector<128x32xbf16>, vector<16x32xf32> -> vector<16x32xf32>
    %c0_19 = arith.constant 0 : index
    %c0_20 = arith.constant 0 : index
    %39 = vector.load %arg7[%c0_19, %c0_20] : memref<1x32xf32, #tpu.memory_space<vmem>>, vector<1x32xf32>
    %40 = vector.broadcast %39 : vector<1x32xf32> to vector<16x32xf32>
    %41 = arith.addf %38, %40 : vector<16x32xf32>
    %c0_21 = arith.constant 0 : index
    %c0_22 = arith.constant 0 : index
    %42 = vector.load %arg8[%c0_21, %c0_22] : memref<16x32xf32, #tpu.memory_space<vmem>>, vector<16x32xf32>
    tpu.vector_store %arg8[%c0_21, %c0_22], %41 {strides = array<i32>} : memref<16x32xf32, #tpu.memory_space<vmem>>, vector<16x32xf32>,
    return
  }
  func.func @transform_0(%arg0: i32) -> (i32, i32) {
    %c0_i32 = arith.constant 0 : i32
    %c0_i32_0 = arith.constant 0 : i32
    return %arg0, %c0_i32 : i32, i32
  }
  func.func @transform_1(%arg0: i32) -> (i32, i32) {
    %c0_i32 = arith.constant 0 : i32
    %c0_i32_0 = arith.constant 0 : i32
    %c0_i32_1 = arith.constant 0 : i32
    return %c0_i32, %c0_i32_0 : i32, i32
  }
  func.func @transform_2(%arg0: i32) -> (i32, i32) {
    %c0_i32 = arith.constant 0 : i32
    %c0_i32_0 = arith.constant 0 : i32
    %c0_i32_1 = arith.constant 0 : i32
    return %c0_i32, %c0_i32_0 : i32, i32
  }
  func.func @transform_3(%arg0: i32) -> (i32, i32) {
    %c0_i32 = arith.constant 0 : i32
    %c0_i32_0 = arith.constant 0 : i32
    %c0_i32_1 = arith.constant 0 : i32
    return %c0_i32, %c0_i32_0 : i32, i32
  }
  func.func @transform_4(%arg0: i32) -> (i32, i32) {
    %c0_i32 = arith.constant 0 : i32
    %c0_i32_0 = arith.constant 0 : i32
    %c0_i32_1 = arith.constant 0 : i32
    return %c0_i32, %c0_i32_0 : i32, i32
  }
  func.func @transform_5(%arg0: i32) -> (i32, i32) {
    %c0_i32 = arith.constant 0 : i32
    %c0_i32_0 = arith.constant 0 : i32
    %c0_i32_1 = arith.constant 0 : i32
    return %c0_i32, %c0_i32_0 : i32, i32
  }
  func.func @transform_6(%arg0: i32) -> (i32, i32) {
    %c0_i32 = arith.constant 0 : i32
    %c0_i32_0 = arith.constant 0 : i32
    %c0_i32_1 = arith.constant 0 : i32
    return %c0_i32, %c0_i32_0 : i32, i32
  }
  func.func @transform_7(%arg0: i32) -> (i32, i32) {
    %c0_i32 = arith.constant 0 : i32
    %c0_i32_0 = arith.constant 0 : i32
    return %arg0, %c0_i32 : i32, i32
  }
}

</mosaic_0001>

<bundles_post_ra>
// kernel: tpu_custom_call.1
= control target key start
LH: loop header
LB: loop body
LE: loop exit
PB: predicated region body
PF: predicated region fallthrough
CT: control target
= control target key end

     0   :  { %vm30_vm0 = vcmask 261120   ;;  %s493_s0 = inlined_call_operand.vmem [shape: f32[16,32], index: 0, kind: input, shape index: {}]   ;;  %s494_s1 = inlined_call_operand.vmem [shape: f32[1,32], index: 1, kind: input, shape index: {}]   ;;  %s495_s2 = inlined_call_operand.vmem [shape: f32[1,32], index: 2, kind: input, shape index: {}]   ;;  %s496_s3 = inlined_call_operand.vmem [shape: bf16[32,128], index: 3, kind: input, shape index: {}]   ;;  %s497_s4 = inlined_call_operand.vmem [shape: f32[1,128], index: 4, kind: input, shape index: {}]   ;;  %s498_s5 = inlined_call_operand.vmem [shape: bf16[128,32], index: 5, kind: input, shape index: {}]   ;;  %s499_s6 = inlined_call_operand.vmem [shape: f32[1,32], index: 6, kind: input, shape index: {}]   ;;  %s500_s7 = inlined_call_operand.hbm [shape: f32[16,32], index: 7, kind: output, shape index: {}]  }
   0x1   :  { %v28_v0 = vld [vmem:[%s493_s0] sm:$0xff]  ;;  %v29_v1 = vld [vmem:[%s493_s0 + $0x8] sm:$0xff] }
   0x2   :  { %v31_v2 = vsel %vm30_vm0, %v28_v0, 0.0  ;;  %v34_v3 = vsel %vm30_vm0, %v29_v1, 0.0 }
   0x3   :  { %32 = vadd.xlane.f32.xlu0 %v31_v2 }
   0x7   :  { %35 = vadd.xlane.f32.xlu0 %v34_v3 }
   0x8   :  { %12 = vsyncpa [#allocation3], 0  ;;  %v346_v14 = vld [vmem:[%s496_s3 + $0x8] sm:$0xff]   ;;  %v390_v15 = vmov 0.0   ;;  %vm391_vm1 = vmmov 0   ;;  %v347_v16 = vld [vmem:[%s496_s3] sm:$0xff]  }
   0x9   :  { %313 = vmatprep.subr.bf16.mxu0 %v390_v15  ;;  %317 = vmatprep.mubr.msk.bf16.mxu0 %vm391_vm1, %v390_v15  ;;  %v286_v25 = vld [vmem:[%s494_s1] ss:$0 sm:$0xff]  ;;  %v348_v34 = vld [vmem:[%s498_s5 + $0x38] sm:$0xff]   ;;  %v349_v35 = vld [vmem:[%s498_s5 + $0x30] sm:$0xff]   ;;  %s392_s27 = smov [#allocation2]  }
   0xa   :  { %314 = vmatpush3.bf16.msra.mxu0 %v346_v14  ;;  %321 = vmatprep.subr.bf16.mxu1 %v390_v15  ;;  %v287_v29 = vld [vmem:[%s495_s2] ss:$0 sm:$0xff]  ;;  %v350_v36 = vld [vmem:[%s498_s5 + $0x28] sm:$0xff]   ;;  %v352_v38 = vld [vmem:[%s498_s5 + $0x18] sm:$0xff]   ;;  %s275_s0 = sshll.u32 %s392_s27, 4  ;;  %s276_s0 = int_to_ptr.vmem [resolvable:$true] %s275_s0 }
   0xb   :  { %315 = vmatprep.subr.bf16.mxu0 %v390_v15  ;;  %337 = vmatprep.mubr.msk.bf16.mxu1 %vm391_vm1, %v390_v15  ;;  %v351_v37 = vld [vmem:[%s498_s5 + $0x20] sm:$0xff]   ;;  %v353_v39 = vld [vmem:[%s498_s5 + $0x10] sm:$0xff]   ;;  %v354_v40 = vld [vmem:[%s498_s5 + $0x8] sm:$0xff]   ;;  %s368_s28 = scalar_lea.vmem %s276_s0, 256  ;;  %p373_p1 = scmp.lt.s32.totalorder %s276_s0, %s276_s0 }
   0xc   :  { %322 = vmatpush3.bf16.msra.mxu1 %v348_v34  ;;  %v355_v41 = vld [vmem:[%s498_s5] sm:$0xff]   ;;  %p369_p0 = scmp.ne.s32.totalorder %s276_s0, %s368_s28  ;;  %p374_p2 = scmp.lt.s32.totalorder %s368_s28, %s368_s28 }
   0xd   :  { %323 = vmatprep.subr.bf16.mxu1 %v390_v15  ;;  %v288_v42 = vld [vmem:[%s497_s4] ss:$0 sm:$0xff] }
   0xe   :  { %316 = vmatpush3.bf16.msra.mxu0 %v347_v16  ;;  %v292_v62 = vld [vmem:[%s499_s6] ss:$0 sm:$0xff]  ;;  %p375_p3 = por %p374_p2, %p373_p1 }
  0x10   :  { %324 = vmatpush3.bf16.msra.mxu1 %v349_v35  ;;  %p376_p4 = pnand %p375_p3, %p369_p0 }
  0x11   :  { %325 = vmatprep.subr.bf16.mxu1 %v390_v15 }
  0x14   :  { %326 = vmatpush3.bf16.msra.mxu1 %v350_v36 }
  0x15   :  { %327 = vmatprep.subr.bf16.mxu1 %v390_v15 }
  0x18   :  { %328 = vmatpush3.bf16.msra.mxu1 %v351_v37 }
  0x19   :  { %329 = vmatprep.subr.bf16.mxu1 %v390_v15 }
  0x1c   :  { %330 = vmatpush3.bf16.msra.mxu1 %v352_v38 }
  0x1d   :  { %331 = vmatprep.subr.bf16.mxu1 %v390_v15 }
  0x20   :  { %332 = vmatpush3.bf16.msra.mxu1 %v353_v39 }
  0x21   :  { %333 = vmatprep.subr.bf16.mxu1 %v390_v15 }
  0x24   :  { %334 = vmatpush3.bf16.msra.mxu1 %v354_v40 }
  0x25   :  { %335 = vmatprep.subr.bf16.mxu1 %v390_v15 }
  0x28   :  { %336 = vmatpush3.bf16.msra.mxu1 %v355_v41 }
  0x8c   :  { %v33_v4 = vpop.xlane.xlu0 %32 }
  0x8d   :  { %v37_v5 = vmul.f32 0.03125, %v33_v4 }
  0x8f   :  { %v39_v6 = vsub.f32 %v28_v0, %v37_v5 }
  0x90   :  { %v36_v7 = vpop.xlane.xlu0 %35 }
  0x91   :  { %v38_v8 = vmul.f32 0.03125, %v36_v7  ;;  %v41_v9 = vmul.f32 %v39_v6, %v39_v6 }
  0x93   :  { %v40_v10 = vsub.f32 %v29_v1, %v38_v8  ;;  %v43_v11 = vsel %vm30_vm0, %v41_v9, 0.0 }
  0x94   :  { %44 = vadd.xlane.f32.xlu1 %v43_v11 }
  0x95   :  { %v42_v12 = vmul.f32 %v40_v10, %v40_v10 }
  0x97   :  { %v46_v13 = vsel %vm30_vm0, %v42_v12, 0.0 }
  0x98   :  { %47 = vadd.xlane.f32.xlu1 %v46_v13 }
 0x11d   :  { %v45_v17 = vpop.xlane.xlu1 %44 }
 0x11e   :  { %v49_v18 = vmul.f32 0.03125, %v45_v17 }
 0x120   :  { %v51_v19 = vadd.f32 1e-05, %v49_v18 }
 0x121   :  { %v48_v20 = vpop.xlane.xlu1 %47 }
 0x122   :  { %356 = vrsqrt.f32 %v51_v19  ;;  %v50_v21 = vmul.f32 0.03125, %v48_v20 }
 0x124   :  { %v52_v22 = vadd.f32 1e-05, %v50_v21 }
 0x126   :  { %358 = vrsqrt.f32 %v52_v22 }
 0x12f   :  { %v357_v23 = vpop.eup %356 }
 0x130   :  { %v55_v24 = vmul.f32 %v357_v23, %v39_v6 }
 0x132   :  { %v64_v28 = vmul.f32 %v286_v25, %v55_v24 }
 0x133   :  { %v359_v26 = vpop.eup %358 }
 0x134   :  { %v56_v27 = vmul.f32 %v359_v26, %v40_v10  ;;  %v73_v31 = vadd.f32 %v287_v29, %v64_v28 }
 0x136   :  { %v65_v30 = vmul.f32 %v286_v25, %v56_v27 }
 0x138   :  { %v74_v32 = vadd.f32 %v287_v29, %v65_v30 }
 0x13a   :  { %v75_v33 = vpack.c.bf16 %v74_v32, %v73_v31 }
 0x13c   :  { %318 = vmatmul.mubr.msk.bf16.vlgmr.msra.gmra.mxu0 %vm30_vm0, %v75_v33 }
 0x1fc   :  { %v136_v43 = vpop.f32.mrf.mxu0 }
 0x1fd   :  { %v137_v44 = vadd.f32 %v288_v42, %v136_v43 }
 0x1fe   :  { %v319_v45 = vpop.f32.mrf.mxu0 }
 0x1ff   :  { %v143_v46 = vsub.f32 0.0, %v137_v44 }
 0x200   :  { %v139_v47 = vpop.f32.mrf.mxu0 }
 0x201   :  { %v145_v48 = vmul.f32 1.442695, %v143_v46  ;;  %v140_v49 = vadd.f32 %v288_v42, %v139_v47 }
 0x202   :  { %v320_v50 = vpop.f32.mrf.mxu0 }
 0x203   :  { %360 = vpow2.f32 %v145_v48  ;;  %v144_v51 = vsub.f32 0.0, %v140_v49 }
 0x205   :  { %v147_v52 = vmul.f32 1.442695, %v144_v51 }
 0x207   :  { %362 = vpow2.f32 %v147_v52 }
 0x210   :  { %v361_v53 = vpop.eup %360 }
 0x211   :  { %v149_v54 = vadd.f32 1.0, %v361_v53 }
 0x213   :  { %364 = vrcp.f32 %v149_v54 }
 0x214   :  { %v363_v55 = vpop.eup %362 }
 0x215   :  { %v150_v56 = vadd.f32 1.0, %v363_v55 }
 0x217   :  { %366 = vrcp.f32 %v150_v56 }
 0x220   :  { %v365_v57 = vpop.eup %364 }
 0x221   :  { %v153_v59 = vmul.f32 %v365_v57, %v137_v44 }
 0x224   :  { %v367_v58 = vpop.eup %366 }
 0x225   :  { %v154_v60 = vmul.f32 %v367_v58, %v140_v49 }
 0x227   :  { %v155_v61 = vpack.c.bf16 %v154_v60, %v153_v59 }
 0x229   :  { %338 = vmatmul.mubr.bf16.vlgmr.msra.gmra.mxu1 %v155_v61 }
 0x2e9   :  { %v261_v63 = vpop.f32.mrf.mxu1 }
 0x2ea   :  { %v262_v0 = vadd.f32 %v292_v62, %v261_v63 }
 0x2eb   :  { %v339_v1 = vpop.f32.mrf.mxu1 }
 0x2ec   :  { %268 = vst.msk [vmem:[#allocation2] sm:$0xff] %vm30_vm0, %v262_v0 }
 0x2ed   :  { %v264_v2 = vpop.f32.mrf.mxu1 }
 0x2ee   :  { %v265_v3 = vadd.f32 %v292_v62, %v264_v2 }
 0x2ef   :  { %v340_v4 = vpop.f32.mrf.mxu1 }
 0x2f0   :  { %269 = vst.msk [vmem:[#allocation2 + $0x8] sm:$0xff] %vm30_vm0, %v265_v3 }
 0x2f1   :  { %379 = shalt.err (!%p376_p4)
}
 0x2f2   :  { %s393_s6 = smov 128   ;;  %s394_s29 = smov 8  }
 0x2f3   :  { %281 = dma.vmem_to_hbm [thread:$0]  %s276_s0, 256, %s500_s7, [#allocation3], %s393_s6, %s393_s6, %s394_s29  }
 0x2f4   :  { %388 = dma.done.wait [#allocation3], 256  }
 0x2f5   :  { %389 = vsyncadd [#allocation3], 4294967040 }
 0x2f6   :  { %285 = vsyncpa [#allocation3], 1 }

// kernel: tpu_custom_call.1
= control target key start
LH: loop header
LB: loop body
LE: loop exit
PB: predicated region body
PF: predicated region fallthrough
CT: control target
= control target key end

     0   :  { %vm30_vm0 = vcmask 261120   ;;  %s493_s0 = inlined_call_operand.vmem [shape: f32[16,32], index: 0, kind: input, shape index: {}]   ;;  %s494_s1 = inlined_call_operand.vmem [shape: f32[1,32], index: 1, kind: input, shape index: {}]   ;;  %s495_s2 = inlined_call_operand.vmem [shape: f32[1,32], index: 2, kind: input, shape index: {}]   ;;  %s496_s3 = inlined_call_operand.vmem [shape: bf16[32,128], index: 3, kind: input, shape index: {}]   ;;  %s497_s4 = inlined_call_operand.vmem [shape: f32[1,128], index: 4, kind: input, shape index: {}]   ;;  %s498_s5 = inlined_call_operand.vmem [shape: bf16[128,32], index: 5, kind: input, shape index: {}]   ;;  %s499_s6 = inlined_call_operand.vmem [shape: f32[1,32], index: 6, kind: input, shape index: {}]   ;;  %s500_s7 = inlined_call_operand.hbm [shape: f32[16,32], index: 7, kind: output, shape index: {}]  }
   0x1   :  { %v28_v0 = vld [vmem:[%s493_s0] sm:$0xff]  ;;  %v29_v1 = vld [vmem:[%s493_s0 + $0x8] sm:$0xff] }
   0x2   :  { %v31_v2 = vsel %vm30_vm0, %v28_v0, 0.0  ;;  %v34_v3 = vsel %vm30_vm0, %v29_v1, 0.0 }
   0x3   :  { %32 = vadd.xlane.f32.xlu0 %v31_v2 }
   0x7   :  { %35 = vadd.xlane.f32.xlu0 %v34_v3 }
   0x8   :  { %12 = vsyncpa [#allocation3], 0  ;;  %v346_v14 = vld [vmem:[%s496_s3 + $0x8] sm:$0xff]   ;;  %v390_v15 = vmov 0.0   ;;  %vm391_vm1 = vmmov 0   ;;  %v347_v16 = vld [vmem:[%s496_s3] sm:$0xff]  }
   0x9   :  { %313 = vmatprep.subr.bf16.mxu0 %v390_v15  ;;  %317 = vmatprep.mubr.msk.bf16.mxu0 %vm391_vm1, %v390_v15  ;;  %v286_v25 = vld [vmem:[%s494_s1] ss:$0 sm:$0xff]  ;;  %v348_v34 = vld [vmem:[%s498_s5 + $0x38] sm:$0xff]   ;;  %v349_v35 = vld [vmem:[%s498_s5 + $0x30] sm:$0xff]   ;;  %s392_s27 = smov [#allocation2]  }
   0xa   :  { %314 = vmatpush3.bf16.msra.mxu0 %v346_v14  ;;  %321 = vmatprep.subr.bf16.mxu1 %v390_v15  ;;  %v287_v29 = vld [vmem:[%s495_s2] ss:$0 sm:$0xff]  ;;  %v350_v36 = vld [vmem:[%s498_s5 + $0x28] sm:$0xff]   ;;  %v352_v38 = vld [vmem:[%s498_s5 + $0x18] sm:$0xff]   ;;  %s275_s0 = sshll.u32 %s392_s27, 4  ;;  %s276_s0 = int_to_ptr.vmem [resolvable:$true] %s275_s0 }
   0xb   :  { %315 = vmatprep.subr.bf16.mxu0 %v390_v15  ;;  %337 = vmatprep.mubr.msk.bf16.mxu1 %vm391_vm1, %v390_v15  ;;  %v351_v37 = vld [vmem:[%s498_s5 + $0x20] sm:$0xff]   ;;  %v353_v39 = vld [vmem:[%s498_s5 + $0x10] sm:$0xff]   ;;  %v354_v40 = vld [vmem:[%s498_s5 + $0x8] sm:$0xff]   ;;  %s368_s28 = scalar_lea.vmem %s276_s0, 256  ;;  %p373_p1 = scmp.lt.s32.totalorder %s276_s0, %s276_s0 }
   0xc   :  { %322 = vmatpush3.bf16.msra.mxu1 %v348_v34  ;;  %v355_v41 = vld [vmem:[%s498_s5] sm:$0xff]   ;;  %p369_p0 = scmp.ne.s32.totalorder %s276_s0, %s368_s28  ;;  %p374_p2 = scmp.lt.s32.totalorder %s368_s28, %s368_s28 }
   0xd   :  { %323 = vmatprep.subr.bf16.mxu1 %v390_v15  ;;  %v288_v42 = vld [vmem:[%s497_s4] ss:$0 sm:$0xff] }
   0xe   :  { %316 = vmatpush3.bf16.msra.mxu0 %v347_v16  ;;  %v292_v62 = vld [vmem:[%s499_s6] ss:$0 sm:$0xff]  ;;  %p375_p3 = por %p374_p2, %p373_p1 }
  0x10   :  { %324 = vmatpush3.bf16.msra.mxu1 %v349_v35  ;;  %p376_p4 = pnand %p375_p3, %p369_p0 }
  0x11   :  { %325 = vmatprep.subr.bf16.mxu1 %v390_v15 }
  0x14   :  { %326 = vmatpush3.bf16.msra.mxu1 %v350_v36 }
  0x15   :  { %327 = vmatprep.subr.bf16.mxu1 %v390_v15 }
  0x18   :  { %328 = vmatpush3.bf16.msra.mxu1 %v351_v37 }
  0x19   :  { %329 = vmatprep.subr.bf16.mxu1 %v390_v15 }
  0x1c   :  { %330 = vmatpush3.bf16.msra.mxu1 %v352_v38 }
  0x1d   :  { %331 = vmatprep.subr.bf16.mxu1 %v390_v15 }
  0x20   :  { %332 = vmatpush3.bf16.msra.mxu1 %v353_v39 }
  0x21   :  { %333 = vmatprep.subr.bf16.mxu1 %v390_v15 }
  0x24   :  { %334 = vmatpush3.bf16.msra.mxu1 %v354_v40 }
  0x25   :  { %335 = vmatprep.subr.bf16.mxu1 %v390_v15 }
  0x28   :  { %336 = vmatpush3.bf16.msra.mxu1 %v355_v41 }
  0x8c   :  { %v33_v4 = vpop.xlane.xlu0 %32 }
  0x8d   :  { %v37_v5 = vmul.f32 0.03125, %v33_v4 }
  0x8f   :  { %v39_v6 = vsub.f32 %v28_v0, %v37_v5 }
  0x90   :  { %v36_v7 = vpop.xlane.xlu0 %35 }
  0x91   :  { %v38_v8 = vmul.f32 0.03125, %v36_v7  ;;  %v41_v9 = vmul.f32 %v39_v6, %v39_v6 }
  0x93   :  { %v40_v10 = vsub.f32 %v29_v1, %v38_v8  ;;  %v43_v11 = vsel %vm30_vm0, %v41_v9, 0.0 }
  0x94   :  { %44 = vadd.xlane.f32.xlu1 %v43_v11 }
  0x95   :  { %v42_v12 = vmul.f32 %v40_v10, %v40_v10 }
  0x97   :  { %v46_v13 = vsel %vm30_vm0, %v42_v12, 0.0 }
  0x98   :  { %47 = vadd.xlane.f32.xlu1 %v46_v13 }
 0x11d   :  { %v45_v17 = vpop.xlane.xlu1 %44 }
 0x11e   :  { %v49_v18 = vmul.f32 0.03125, %v45_v17 }
 0x120   :  { %v51_v19 = vadd.f32 1e-05, %v49_v18 }
 0x121   :  { %v48_v20 = vpop.xlane.xlu1 %47 }
 0x122   :  { %356 = vrsqrt.f32 %v51_v19  ;;  %v50_v21 = vmul.f32 0.03125, %v48_v20 }
 0x124   :  { %v52_v22 = vadd.f32 1e-05, %v50_v21 }
 0x126   :  { %358 = vrsqrt.f32 %v52_v22 }
 0x12f   :  { %v357_v23 = vpop.eup %356 }
 0x130   :  { %v55_v24 = vmul.f32 %v357_v23, %v39_v6 }
 0x132   :  { %v64_v28 = vmul.f32 %v286_v25, %v55_v24 }
 0x133   :  { %v359_v26 = vpop.eup %358 }
 0x134   :  { %v56_v27 = vmul.f32 %v359_v26, %v40_v10  ;;  %v73_v31 = vadd.f32 %v287_v29, %v64_v28 }
 0x136   :  { %v65_v30 = vmul.f32 %v286_v25, %v56_v27 }
 0x138   :  { %v74_v32 = vadd.f32 %v287_v29, %v65_v30 }
 0x13a   :  { %v75_v33 = vpack.c.bf16 %v74_v32, %v73_v31 }
 0x13c   :  { %318 = vmatmul.mubr.msk.bf16.vlgmr.msra.gmra.mxu0 %vm30_vm0, %v75_v33 }
 0x1fc   :  { %v136_v43 = vpop.f32.mrf.mxu0 }
 0x1fd   :  { %v137_v44 = vadd.f32 %v288_v42, %v136_v43 }
 0x1fe   :  { %v319_v45 = vpop.f32.mrf.mxu0 }
 0x1ff   :  { %v143_v46 = vsub.f32 0.0, %v137_v44 }
 0x200   :  { %v139_v47 = vpop.f32.mrf.mxu0 }
 0x201   :  { %v145_v48 = vmul.f32 1.442695, %v143_v46  ;;  %v140_v49 = vadd.f32 %v288_v42, %v139_v47 }
 0x202   :  { %v320_v50 = vpop.f32.mrf.mxu0 }
 0x203   :  { %360 = vpow2.f32 %v145_v48  ;;  %v144_v51 = vsub.f32 0.0, %v140_v49 }
 0x205   :  { %v147_v52 = vmul.f32 1.442695, %v144_v51 }
 0x207   :  { %362 = vpow2.f32 %v147_v52 }
 0x210   :  { %v361_v53 = vpop.eup %360 }
 0x211   :  { %v149_v54 = vadd.f32 1.0, %v361_v53 }
 0x213   :  { %364 = vrcp.f32 %v149_v54 }
 0x214   :  { %v363_v55 = vpop.eup %362 }
 0x215   :  { %v150_v56 = vadd.f32 1.0, %v363_v55 }
 0x217   :  { %366 = vrcp.f32 %v150_v56 }
 0x220   :  { %v365_v57 = vpop.eup %364 }
 0x221   :  { %v153_v59 = vmul.f32 %v365_v57, %v137_v44 }
 0x224   :  { %v367_v58 = vpop.eup %366 }
 0x225   :  { %v154_v60 = vmul.f32 %v367_v58, %v140_v49 }
 0x227   :  { %v155_v61 = vpack.c.bf16 %v154_v60, %v153_v59 }
 0x229   :  { %338 = vmatmul.mubr.bf16.vlgmr.msra.gmra.mxu1 %v155_v61 }
 0x2e9   :  { %v261_v63 = vpop.f32.mrf.mxu1 }
 0x2ea   :  { %v262_v0 = vadd.f32 %v292_v62, %v261_v63 }
 0x2eb   :  { %v339_v1 = vpop.f32.mrf.mxu1 }
 0x2ec   :  { %268 = vst.msk [vmem:[#allocation2] sm:$0xff] %vm30_vm0, %v262_v0 }
 0x2ed   :  { %v264_v2 = vpop.f32.mrf.mxu1 }
 0x2ee   :  { %v265_v3 = vadd.f32 %v292_v62, %v264_v2 }
 0x2ef   :  { %v340_v4 = vpop.f32.mrf.mxu1 }
 0x2f0   :  { %269 = vst.msk [vmem:[#allocation2 + $0x8] sm:$0xff] %vm30_vm0, %v265_v3 }
 0x2f1   :  { %379 = shalt.err (!%p376_p4)
}
 0x2f2   :  { %s393_s6 = smov 128   ;;  %s394_s29 = smov 8  }
 0x2f3   :  { %281 = dma.vmem_to_hbm [thread:$0]  %s276_s0, 256, %s500_s7, [#allocation3], %s393_s6, %s393_s6, %s394_s29  }
 0x2f4   :  { %388 = dma.done.wait [#allocation3], 256  }
 0x2f5   :  { %389 = vsyncadd [#allocation3], 4294967040 }
 0x2f6   :  { %285 = vsyncpa [#allocation3], 1 }

</bundles_post_ra>
